<compile_context>
chip_gen: v7x
topology: tpu7x:2x2x1
jax: 0.10.0
libtpu: 0.0.40
codegen_flags: <defaults>
</compile_context>

<pallas_src>
import numpy as np
import jax
import jax.numpy as jnp
from jax import lax
from jax.experimental import pallas as pl
from jax.experimental.pallas import tpu as pltpu


# ----------------------------------------------------------------------------
# Pallas kernel: one bf16 GEMM (phase-merged deconv) + BatchNorm-stat epilogue
# ----------------------------------------------------------------------------
def _deconv_bnstat_kernel(p_ref, w_ref, y_ref, s_ref):
    """p_ref : (1, M, 9*Cin)  bf16 pre-interleaved patch tile (taps contiguous on lanes)
    w_ref : (9*Cin, Np)     bf16 phase-merged weight (lane-padded to Np)
    y_ref : (1, M, Np)      f32 phase-major conv output tile (lane-dense)
    s_ref : (1, 1, 2, Np)   f32 per-tile [sum ; sum-of-squares] for BatchNorm
    """
    M, K = p_ref.shape[1], p_ref.shape[2]
    Np = w_ref.shape[1]

    lhs = p_ref[...].reshape(M, K)                        # straight load, no relayout
    acc = jnp.dot(lhs, w_ref[...],                        # single K=9*Cin MXU GEMM
                  preferred_element_type=jnp.float32)     # f32 accumulation
    y_ref[...] = acc.reshape(1, M, Np)

    # BatchNorm statistics epilogue (per phase-channel; combined outside).
    ssum = jnp.sum(acc, axis=0, keepdims=True)            # (1, Np)
    ssq = jnp.sum(acc * acc, axis=0, keepdims=True)       # (1, Np)
    s_ref[...] = jnp.concatenate([ssum, ssq], axis=0).reshape(1, 1, 2, Np)


# ----------------------------------------------------------------------------
# Parameter preparation (init-time; folds weight reshapes into the pytree)
# ----------------------------------------------------------------------------
def _round_up(x, m):
    return (x + m - 1) // m * m


def prepare_params(wt, bias, gamma, beta, lane=128):
    """wt: torch ConvTranspose2d weight (Cin, Cout, 4, 4); bias/gamma/beta: (Cout,).

    NOTE: the ConvTranspose2d bias is intentionally NOT used — a per-channel
    constant shift before a training-mode BatchNorm cancels exactly, so dropping
    it removes a full VALU pass + an input DMA with zero change to the output.
    """
    del bias  # cancels under training-mode BatchNorm (see note above)
    Cin, Cout = wt.shape[0], wt.shape[1]
    Np = _round_up(4 * Cout, lane)
    wt_np = np.asarray(wt, np.float32)

    wm = np.zeros((9 * Cin, Np), np.float32)
    # Output (2q+ry, 2p+rx) reads padded-input (q+dy, p+dx) with kernel tap
    # (kh, kw) = (ry+3-2*dy, rx+3-2*dx) when that tap is inside the 4x4 kernel.
    for ry in range(2):
        for rx in range(2):
            slot = (ry * 2 + rx) * Cout
            for dy in range(3):
                for dx in range(3):
                    kh = ry + 3 - 2 * dy
                    kw = rx + 3 - 2 * dx
                    if 0 <= kh < 4 and 0 <= kw < 4:
                        k0 = (dy * 3 + dx) * Cin
                        wm[k0:k0 + Cin, slot:slot + Cout] = wt_np[:, :, kh, kw]

    return {
        "wm": jnp.asarray(wm, jnp.bfloat16),   # (9*Cin, Np) phase-merged GEMM weight
        "gamma": jnp.asarray(gamma, jnp.float32),
        "beta": jnp.asarray(beta, jnp.float32),
        "Cout": Cout,
        "Np": Np,
    }


# ----------------------------------------------------------------------------
# Forward
# ----------------------------------------------------------------------------
def _pick_row_tile(H, W, Np, max_block_bytes=4 << 20):
    """Largest divisor of H whose f32 output block stays comfortably in VMEM."""
    tq = H
    while tq > 1 and (tq * W * Np * 4 > max_block_bytes or H % tq):
        tq -= 1
    return tq


def decoder_block_forward(x_nchw, params, *, eps=1e-5, slope=1.0):
    N, Cin, H, W = x_nchw.shape
    Cout, Np = params["Cout"], params["Np"]
    K = 9 * Cin
    assert params["wm"].shape[0] == K

    TQ = _pick_row_tile(H, W, Np)
    n_qt = H // TQ
    M = TQ * W
    assert n_qt == 1 or M % 16 == 0, "TODO(synk): ragged/unaligned row tiles"

    # --- wrapper-side layout plumbing (module boundary) ----------------------
    # NCHW -> NHWC, spatial zero pad of 1, then pre-interleaved im2col so each
    # output pixel's 9*Cin tap values form one contiguous lane range.  bf16 for
    # the MXU (f32 accumulation inside the kernel).
    x_nhwc = jnp.transpose(x_nchw, (0, 2, 3, 1)).astype(jnp.float32)
    xp = jnp.pad(x_nhwc, ((0, 0), (1, 1), (1, 1), (0, 0)))
    taps = [xp[:, dy:dy + H, dx:dx + W, :] for dy in range(3) for dx in range(3)]
    patches = jnp.concatenate(taps, axis=-1).reshape(N, H * W, K).astype(jnp.bfloat16)

    flops = 2 * (N * H * W) * K * Np
    bytes_accessed = (patches.size * 2 + params["wm"].size * 2
                      + N * H * W * Np * 4 + N * n_qt * 2 * Np * 4)

    y_phase, stats = pl.pallas_call(
        _deconv_bnstat_kernel,
        grid=(N, n_qt),
        in_specs=[
            pl.BlockSpec((1, M, K), lambda n, q: (n, q, 0)),
            pl.BlockSpec((K, Np), lambda n, q: (0, 0)),
        ],
        out_specs=(
            pl.BlockSpec((1, M, Np), lambda n, q: (n, q, 0)),
            pl.BlockSpec((1, 1, 2, Np), lambda n, q: (n, q, 0, 0)),
        ),
        out_shape=(
            jax.ShapeDtypeStruct((N, H * W, Np), jnp.float32),
            jax.ShapeDtypeStruct((N, n_qt, 2, Np), jnp.float32),
        ),
        compiler_params=pltpu.CompilerParams(
            dimension_semantics=("parallel", "parallel")),
        cost_estimate=pl.CostEstimate(flops=flops, transcendentals=0,
                                      bytes_accessed=bytes_accessed),
    )(patches, params["wm"])

    # --- tiny XLA reduction: partial sums -> per-channel BN scale/shift ------
    # (Padded lane columns excluded; E[x^2]-E[x]^2 in f32 is fine at this
    #  tolerance — see review's precision note.)
    s = jnp.sum(stats, axis=(0, 1))                            # (2, Np)
    sc = s[:, :4 * Cout].reshape(2, 4, Cout).sum(axis=1)       # (2, Cout)
    count = float(N * (2 * H) * (2 * W))
    mean = sc[0] / count
    var = sc[1] / count - mean * mean                          # biased, like torch
    scale_c = params["gamma"] * lax.rsqrt(var + eps)
    shift_c = params["beta"] - mean * scale_c

    # --- fused epilogue (single XLA fusion, no extra HBM round trip) ---------
    # crop lane padding -> BN affine -> LeakyReLU (identity when slope==1.0)
    # -> depth-to-space -> NCHW.
    y = y_phase[:, :, :4 * Cout].reshape(N, H, W, 2, 2, Cout)
    z = y * scale_c + shift_c
    if slope != 1.0:  # LeakyReLU(True) => slope 1.0 => identity; skip the select
        z = jnp.where(z >= 0, z, slope * z)
    z = z.transpose(0, 1, 3, 2, 4, 5).reshape(N, 2 * H, 2 * W, Cout)
    return jnp.transpose(z, (0, 3, 1, 2))


# ----------------------------------------------------------------------------
# Pure-JAX reference (independent path via lax.conv_general_dilated).
# Operands are quantised to bf16 at the same points as the kernel so the
# comparison checks structure, not bf16 rounding.
# ----------------------------------------------------------------------------
def reference_forward(x, wt, bias, gamma, beta, eps=1e-5, slope=1.0):
    dn = ("NCHW", "OIHW", "NCHW")
    w_eq = jnp.transpose(wt, (1, 0, 2, 3))[:, :, ::-1, ::-1]    # (Cout, Cin, 4, 4)
    y = lax.conv_general_dilated(
        x.astype(jnp.bfloat16), w_eq.astype(jnp.bfloat16),
        (1, 1), ((2, 2), (2, 2)), lhs_dilation=(2, 2),
        dimension_numbers=dn, preferred_element_type=jnp.float32,
        precision=lax.Precision.HIGHEST)
    y = y + bias.reshape(1, -1, 1, 1)
    mean = jnp.mean(y, axis=(0, 2, 3), keepdims=True)
    var = jnp.mean((y - mean) ** 2, axis=(0, 2, 3), keepdims=True)
    y = ((y - mean) * lax.rsqrt(var + eps) * gamma.reshape(1, -1, 1, 1)
         + beta.reshape(1, -1, 1, 1))
    return jnp.where(y >= 0, y, slope * y)                      # LeakyReLU(True) == id


# ----------------------------------------------------------------------------
if __name__ == "__main__":
    key = jax.random.PRNGKey(0)
    k1, k2, k3, k4, k5 = jax.random.split(key, 5)

    N, Cin, Cout, H, W = 2, 4, 8, 16, 16
    x = jax.random.normal(k1, (N, Cin, H, W), jnp.float32)
    # torch ConvTranspose2d weight layout: (in_channels, out_channels, kH, kW)
    wt = 0.1 * jax.random.normal(k2, (Cin, Cout, 4, 4), jnp.float32)
    bias = 0.1 * jax.random.normal(k3, (Cout,), jnp.float32)
    gamma = 1.0 + 0.1 * jax.random.normal(k4, (Cout,), jnp.float32)
    beta = 0.1 * jax.random.normal(k5, (Cout,), jnp.float32)

    params = prepare_params(wt, bias, gamma, beta)
    out = jax.block_until_ready(decoder_block_forward(x, params))

    assert out.shape == (N, Cout, 2 * H, 2 * W), out.shape
    ref = reference_forward(x, wt, bias, gamma, beta)
    if not bool(jnp.allclose(out, ref, atol=5e-3, rtol=5e-3)):
        err = float(jnp.max(jnp.abs(out - ref)))
        raise AssertionError(f"Pallas output mismatch vs JAX reference (max|err|={err})")

    print("KERNEL_OK")
</pallas_src>

<mosaic_0001>
module attributes {stable_mosaic.version = 11 : i64} {
  func.func @_deconv_bnstat_kernel(%arg0: i32, %arg1: i32, %arg2: memref<1x256x36xbf16, #tpu.memory_space<vmem>>, %arg3: memref<36x128xbf16, #tpu.memory_space<vmem>>, %arg4: memref<1x256x128xf32, #tpu.memory_space<vmem>>, %arg5: memref<1x1x2x128xf32, #tpu.memory_space<vmem>>) attributes {dimension_semantics = [#tpu.dimension_semantics<parallel>, #tpu.dimension_semantics<parallel>], iteration_bounds = array<i64: 2, 1>, scalar_prefetch = 0 : i64, scratch_operands = 0 : i64, tpu.core_type = #tpu.core_type<tc>, window_params = [{transform_indices = @transform_0, window_bounds = array<i64: 1, 256, 36>}, {pipeline_mode = #tpu.pipeline_mode<synchronous>, transform_indices = @transform_1, window_bounds = array<i64: 36, 128>}, {transform_indices = @transform_2, window_bounds = array<i64: 1, 256, 128>}, {transform_indices = @transform_3, window_bounds = array<i64: 1, 1, 2, 128>}]} {
    %c0 = arith.constant 0 : index
    %c0_0 = arith.constant 0 : index
    %c0_1 = arith.constant 0 : index
    %0 = vector.load %arg2[%c0, %c0_0, %c0_1] : memref<1x256x36xbf16, #tpu.memory_space<vmem>>, vector<1x256x36xbf16>
    %1 = vector.shape_cast %0 : vector<1x256x36xbf16> to vector<256x36xbf16>
    %c0_2 = arith.constant 0 : index
    %c0_3 = arith.constant 0 : index
    %2 = vector.load %arg3[%c0_2, %c0_3] : memref<36x128xbf16, #tpu.memory_space<vmem>>, vector<36x128xbf16>
    %cst = arith.constant dense<0.000000e+00> : vector<256x128xf32>
    %3 = tpu.matmul %1, %2, %cst {dimension_numbers = #tpu.dot_dimension_numbers<[1], [0], [0], [1], [0, 0, 1, 1], [], []>} : vector<256x36xbf16>, vector<36x128xbf16>, vector<256x128xf32> -> vector<256x128xf32>
    %4 = vector.shape_cast %3 : vector<256x128xf32> to vector<1x256x128xf32>
    %c0_4 = arith.constant 0 : index
    %c0_5 = arith.constant 0 : index
    %c0_6 = arith.constant 0 : index
    %5 = vector.load %arg4[%c0_4, %c0_5, %c0_6] : memref<1x256x128xf32, #tpu.memory_space<vmem>>, vector<1x256x128xf32>
    tpu.vector_store %arg4[%c0_4, %c0_5, %c0_6], %4 {strides = array<i32>} : memref<1x256x128xf32, #tpu.memory_space<vmem>>, vector<1x256x128xf32>,
    %cst_7 = arith.constant dense<0.000000e+00> : vector<128xf32>
    %6 = vector.multi_reduction <add>, %3, %cst_7 [0] : vector<256x128xf32> to vector<128xf32>
    %7 = vector.shape_cast %6 : vector<128xf32> to vector<1x128xf32>
    %8 = arith.mulf %3, %3 : vector<256x128xf32>
    %cst_8 = arith.constant dense<0.000000e+00> : vector<128xf32>
    %9 = vector.multi_reduction <add>, %8, %cst_8 [0] : vector<256x128xf32> to vector<128xf32>
    %10 = vector.shape_cast %9 : vector<128xf32> to vector<1x128xf32>
    %11 = tpu.concatenate %7, %10 in 0 : vector<1x128xf32>, vector<1x128xf32> -> vector<2x128xf32>
    %12 = vector.shape_cast %11 : vector<2x128xf32> to vector<1x1x2x128xf32>
    %c0_9 = arith.constant 0 : index
    %c0_10 = arith.constant 0 : index
    %c0_11 = arith.constant 0 : index
    %c0_12 = arith.constant 0 : index
    %13 = vector.load %arg5[%c0_9, %c0_10, %c0_11, %c0_12] : memref<1x1x2x128xf32, #tpu.memory_space<vmem>>, vector<1x1x2x128xf32>
    tpu.vector_store %arg5[%c0_9, %c0_10, %c0_11, %c0_12], %12 {strides = array<i32>} : memref<1x1x2x128xf32, #tpu.memory_space<vmem>>, vector<1x1x2x128xf32>,
    return
  }
  func.func @transform_0(%arg0: i32, %arg1: i32) -> (i32, i32, i32) {
    %c0_i32 = arith.constant 0 : i32
    %c0_i32_0 = arith.constant 0 : i32
    return %arg0, %arg1, %c0_i32 : i32, i32, i32
  }
  func.func @transform_1(%arg0: i32, %arg1: i32) -> (i32, i32) {
    %c0_i32 = arith.constant 0 : i32
    %c0_i32_0 = arith.constant 0 : i32
    %c0_i32_1 = arith.constant 0 : i32
    return %c0_i32, %c0_i32_0 : i32, i32
  }
  func.func @transform_2(%arg0: i32, %arg1: i32) -> (i32, i32, i32) {
    %c0_i32 = arith.constant 0 : i32
    %c0_i32_0 = arith.constant 0 : i32
    return %arg0, %arg1, %c0_i32 : i32, i32, i32
  }
  func.func @transform_3(%arg0: i32, %arg1: i32) -> (i32, i32, i32, i32) {
    %c0_i32 = arith.constant 0 : i32
    %c0_i32_0 = arith.constant 0 : i32
    %c0_i32_1 = arith.constant 0 : i32
    return %arg0, %arg1, %c0_i32, %c0_i32_0 : i32, i32, i32, i32
  }
}

</mosaic_0001>

<bundles_post_ra>
// kernel: tpu_custom_call.1
= control target key start
LH: loop header
LB: loop body
LE: loop exit
PB: predicated region body
PF: predicated region fallthrough
CT: control target
= control target key end

     0   :  { %9 = vsyncpa [#allocation3], 0  ;;  %s1506_s0 = inlined_call_operand.vmem [shape: bf16[2,256,36], index: 0, kind: input, shape index: {}]   ;;  %s1507_s1 = inlined_call_operand.vmem [shape: bf16[36,128], index: 1, kind: input, shape index: {}]   ;;  %s1508_s2 = inlined_call_operand.hbm [shape: f32[2,256,128], index: 2, kind: output, shape index: {0}]   ;;  %s1509_s3 = inlined_call_operand.hbm [shape: f32[2,1,2,128], index: 3, kind: output, shape index: {1}]  }
   0x1   :  { %11 = vsyncpa [#allocation3 + $0x1], 0 }
   0x2   :  { %12 = vsyncpa [#allocation5], 0 }
   0x3   :  { %14 = vsyncpa [#allocation5 + $0x1], 0  ;;  %s1183_s12 = smov 0   ;;  %s1185_s13 = smov 0  }
   0x4   :  { %s1187_s14 = smov 0   ;;  %s1189_s15 = smov 0  }
   0x5   :  { %s1191_s16 = smov 0   ;;  %s1193_s17 = smov 0  }
   0x6 LB: > { %s848_s18 = sadd.s32 4294967295, %s1157_s17   ;;  %s849_s19 = sadd.s32 4294967294, %s1157_s17   ;;  %s1157_s17 = sphi %s1193_s17, %s20_s17   ;;  %s1153_s16 = sphi %s1191_s16, %s1516_s16   ;;  %s1149_s15 = sphi %s1189_s15, %s1515_s15   ;;  %s1145_s14 = sphi %s1187_s14, %s1514_s14   ;;  %s1141_s13 = sphi %s1185_s13, %s1513_s13   ;;  %s1137_s12 = sphi %s1183_s12, %s1512_s12  }
   0x7   : > { %s32_s20 = sadd.s32 1, %s1153_s16  ;;  %s90_s21 = sadd.s32 1, %s1145_s14 }
   0x8   : > { %p34_p0 = scmp.ge.s32.totalorder %s32_s20, 2  ;;  %p100_p1 = scmp.ne.s32.totalorder %s1145_s14, %s1141_s13 }
   0x9   : > { %p101_p2 = scmp.eq.s32.totalorder %s848_s18, 1  ;;  %p106_p3 = scmp.ne.s32.totalorder %s1141_s13, %s1137_s12 }
   0xa   : > { %s1518_s20 = smov (%p34_p0, %s32_s20), 0  ;;  %p107_p5 = scmp.eq.s32.totalorder %s849_s19, 1 }
   0xb   : > { %p1223_p4 = por %p101_p2, %p100_p1  ;;  %s85_s23 = ssub.s32 %s1153_s16, %s1518_s20 }
   0xc   : > { %p852_p6 = scmp.ge.s32.totalorder %s1157_s17, 1  ;;  %p88_p7 = scmp.eq.s32.totalorder %s85_s23, 0 }
   0xd   : > { %p1230_p8 = por %p107_p5, %p106_p3  ;;  %p169_p9 = scmp.lt.s32.totalorder %s1157_s17, 3 }
   0xe   : > { %s1236_s25 = scalar_select %p88_p7, %s1145_s14, %s90_s21  }
   0xf   : > { %p170_p10 = pnand %p852_p6, %p169_p9 }
  0x10   : > { %v1028_v0 = vld [vmem:[%s1507_s1] sm:$0xff] (!%p170_p10)   ;;  %v1029_v1 = vld [vmem:[%s1507_s1 + $0x8] sm:$0xff] (!%p170_p10)   ;;  %p203_p11 = scmp.lt.s32.totalorder (!%p170_p10), %s1149_s15, 1  ;;  %v1030_v2 = vld [vmem:[%s1507_s1 + $0x10] ss:$0 sps:$4 sm:$0x33] (!%p170_p10)  }
  0x11   : > { %173 = sbr.rel (%p170_p10) target bundleno = 347 (0x15b), region = 28  ;;  %920 = vmatprep.subr.bf16.mxu0 (!%p170_p10), %v1028_v0  ;;  %958 = vmatprep.subr.bf16.mxu1 (!%p170_p10), %v1028_v0  ;;  %vm395_vm0 = vcmask (!%p170_p10), 1041408   ;;  %vm346_vm1 = vcmask (!%p170_p10), 293888   ;;  %s1287_s10 = sand.u32 (!%p170_p10), 1, %s1141_s13  }
  0x12   : > { %921 = vmatpush3.bf16.msra.mxu0 (!%p170_p10), %v1028_v0  ;;  %961 = vmatpush3.bf16.msra.mxu1 (!%p170_p10), %v1028_v0  ;;  %v397_v4 = vsel (!%p170_p10), %vm395_vm0, %v1030_v2, 0  ;;  %s853_s11 = sshll.u32 (!%p170_p10), %s1287_s10, 8  ;;  %s900_s19 = sshll.u32 (!%p170_p10), %s1149_s15, 12 }
  0x13   : > { %922 = vmatprep.subr.bf16.mxu0 (!%p170_p10), %v1029_v1  ;;  %959 = vmatprep.subr.bf16.mxu1 (!%p170_p10), %v1029_v1  ;;  %s1290_s18 = scalar_lea.vmem (!%p170_p10), [#allocation2], %s853_s11  ;;  %s1367_s27 = scalar_lea.hbm (!%p170_p10), %s1508_s2, %s900_s19 }
  0x14   : > { %s722_s21 = sshll.u32 (!%p170_p10), %s1290_s18, 4  ;;  %s702_s28 = scalar_lea.sflag (!%p170_p10), [#allocation3], %s1287_s10  ;;  %s1369_s21 = int_to_ptr.vmem [resolvable:$true] %s722_s21 }
  0x15   : > { %s1047_s29 = scalar_lea.vmem (!%p170_p10), %s1369_s21, 4096 }
  0x16   : > { %923 = vmatpush3.bf16.msra.mxu0 (!%p170_p10), %v1029_v1  ;;  %962 = vmatpush3.bf16.msra.mxu1 (!%p170_p10), %v1029_v1  ;;  %p1048_p12 = scmp.ne.s32.totalorder (!%p170_p10), %s1369_s21, %s1047_s29 }
  0x17   : > { %964 = vmatprep.subr.msk.bf16.mxu0 (!%p170_p10), %vm395_vm0, %v1030_v2  ;;  %965 = vmatprep.subr.msk.bf16.mxu1 (!%p170_p10), %vm395_vm0, %v1030_v2 }
  0x18   : > { %s204_s30 = scalar_select %p203_p11, %s1149_s15, 1 }
  0x19   : > { %p1049_p13 = pnand %p1048_p12, %p1223_p4 }
  0x1a   : > { %s899_s6 = sshll.u32 %s204_s30, 7  ;;  %925 = vmatpush3.bf16.msra.mxu0 %v397_v4  ;;  %963 = vmatpush3.bf16.msra.mxu1 %v397_v4  ;;  %s1159_s30 = smov [#allocation2]  }
  0x1b   : > { %s1252_s9 = scalar_lea.vmem %s1506_s0, %s899_s6  ;;  %p1050_p0 = pneg %p1049_p13 }
  0x1c   : > { %v1031_v3 = vld [vmem:[%s1252_s9] sm:$0xff]   ;;  %v1032_v5 = vld [vmem:[%s1252_s9 + $0x8] sm:$0xff]   ;;  %v1033_v6 = vld [vmem:[%s1252_s9 + $0x10] sm:$0xff]   ;;  %s1051_s4 = sshll.u32 %s1159_s30, 4  ;;  %s1052_s4 = int_to_ptr.vmem [resolvable:$false] %s1051_s4 }
  0x1d   : > { %926 = vmatprep.mubr.msk.bf16.mxu0 %vm346_vm1, %v1031_v3  ;;  %v1039_v7 = vld [vmem:[%s1252_s9 + $0x40] sm:$0xff]   ;;  %v1040_v8 = vld [vmem:[%s1252_s9 + $0x48] sm:$0xff]   ;;  %v1041_v9 = vld [vmem:[%s1252_s9 + $0x50] sm:$0xff]   ;;  %s1053_s5 = scalar_lea.vmem %s1052_s4, 8192  ;;  %p1054_p1 = scmp.lt.s32.totalorder %s1369_s21, %s1052_s4 }
  0x1e   : > { %927 = vmatmul.mubr.msk.bf16.vlgmr.msra.gmra.mrb[0].mxu0 %vm346_vm1, %v1032_v5  ;;  %942 = vmatprep.mubr.msk.bf16.mxu1 %vm346_vm1, %v1039_v7  ;;  %v1034_v10 = vld [vmem:[%s1252_s9 + $0x18] sm:$0xff]   ;;  %v1035_v11 = vld [vmem:[%s1252_s9 + $0x20] sm:$0xff]   ;;  %v1036_v14 = vld [vmem:[%s1252_s9 + $0x28] sm:$0xff]   ;;  %p1055_p2 = scmp.lt.s32.totalorder %s1053_s5, %s1047_s29 }
  0x1f   : > { %930 = vmatprep.mubr.msk.bf16.mxu0 %vm346_vm1, %v1033_v6  ;;  %943 = vmatmul.mubr.msk.bf16.vlgmr.msra.gmra.mrb[0].mxu1 %vm346_vm1, %v1040_v8  ;;  %v1042_v12 = vld [vmem:[%s1252_s9 + $0x58] sm:$0xff]   ;;  %v1043_v13 = vld [vmem:[%s1252_s9 + $0x60] sm:$0xff]   ;;  %v1037_v15 = vld [vmem:[%s1252_s9 + $0x30] sm:$0xff]  }
  0x20   : > { %946 = vmatprep.mubr.msk.bf16.mxu1 %vm346_vm1, %v1041_v9  ;;  %v1044_v16 = vld [vmem:[%s1252_s9 + $0x68] sm:$0xff]   ;;  %v1045_v17 = vld [vmem:[%s1252_s9 + $0x70] sm:$0xff]   ;;  %v1038_v18 = vld [vmem:[%s1252_s9 + $0x38] sm:$0xff]   ;;  %p1056_p3 = por %p1055_p2, %p1054_p1 }
  0x21   : > { %v1046_v19 = vld [vmem:[%s1252_s9 + $0x78] sm:$0xff]  }
  0x22   : > { %p1057_p5 = pnand %p1056_p3, %p1050_p0 }
  0x26   : > { %931 = vmatmul.mubr.msk.bf16.gmra.mrb[4].mxu0 %vm346_vm1, %v1034_v10 }
  0x27   : > { %934 = vmatprep.mubr.msk.bf16.mxu0 %vm346_vm1, %v1035_v11  ;;  %947 = vmatmul.mubr.msk.bf16.gmra.mrb[4].mxu1 %vm346_vm1, %v1042_v12 }
  0x28   : > { %950 = vmatprep.mubr.msk.bf16.mxu1 %vm346_vm1, %v1043_v13 }
  0x2e   : > { %935 = vmatmul.mubr.msk.bf16.gmra.mrb[8].mxu0 %vm346_vm1, %v1036_v14 }
  0x2f   : > { %938 = vmatprep.mubr.msk.bf16.mxu0 %vm346_vm1, %v1037_v15  ;;  %951 = vmatmul.mubr.msk.bf16.gmra.mrb[8].mxu1 %vm346_vm1, %v1044_v16 }
  0x30   : > { %954 = vmatprep.mubr.msk.bf16.mxu1 %vm346_vm1, %v1045_v17 }
  0x36   : > { %939 = vmatmul.mubr.msk.bf16.gmra.mrb[12].mxu0 %vm346_vm1, %v1038_v18 }
  0x37   : > { %955 = vmatmul.mubr.msk.bf16.gmra.mrb[12].mxu1 %vm346_vm1, %v1046_v19 }
  0xf1   : > { %v928_v20 = vpop.f32.mrb[0].mxu0 }
  0xf2   : > { %562 = vst [vmem:[%s1290_s18 + $0x10] sm:$0xff] %v928_v20  ;;  %v433_v21 = vpop.f32.mrb[1].mxu0  ;;  %v1296_v27 = vpop.f32.mrb[0].mxu1  ;;  %v631_v29 = vmul.f32 %v928_v20, %v928_v20 }
  0xf3   : > { %560 = vst [vmem:[%s1290_s18] sm:$0xff] %v433_v21  ;;  %v929_v22 = vpop.f32.mrb[2].mxu0  ;;  %v629_v24 = vmul.f32 %v433_v21, %v433_v21  ;;  %578 = vst [vmem:[%s1290_s18 + $0x90] sm:$0xff] %v1296_v27  ;;  %v1300_v28 = vpop.f32.mrb[1].mxu1 }
  0xf4   : > { %563 = vst [vmem:[%s1290_s18 + $0x18] sm:$0xff] %v929_v22  ;;  %v436_v23 = vpop.f32.mrb[3].mxu0  ;;  %576 = vst [vmem:[%s1290_s18 + $0x80] sm:$0xff] %v1300_v28  ;;  %v1304_v32 = vpop.f32.mrb[2].mxu1  ;;  %v632_v34 = vmul.f32 %v929_v22, %v929_v22 }
  0xf5   : > { %561 = vst [vmem:[%s1290_s18 + $0x8] sm:$0xff] %v436_v23  ;;  %v592_v25 = vadd.f32 %v436_v23, %v433_v21  ;;  %v630_v26 = vmul.f32 %v436_v23, %v436_v23  ;;  %579 = vst [vmem:[%s1290_s18 + $0x98] sm:$0xff] %v1304_v32  ;;  %v1308_v33 = vpop.f32.mrb[3].mxu1 }
  0xf6   : > { %577 = vst [vmem:[%s1290_s18 + $0x88] sm:$0xff] %v1308_v33 }
  0xf7   : > { %v593_v30 = vadd.f32 %v928_v20, %v592_v25  ;;  %v661_v31 = vadd.f32 %v630_v26, %v629_v24 }
  0xf9   : > { %v662_v35 = vadd.f32 %v661_v31, %v631_v29  ;;  %v932_v36 = vpop.f32.mrb[4].mxu0  ;;  %v594_v37 = vadd.f32 %v929_v22, %v593_v30 }
  0xfa   : > { %566 = vst [vmem:[%s1290_s18 + $0x30] sm:$0xff] %v932_v36  ;;  %v449_v38 = vpop.f32.mrb[5].mxu0  ;;  %v1316_v47 = vpop.f32.mrb[4].mxu1  ;;  %v635_v49 = vmul.f32 %v932_v36, %v932_v36 }
  0xfb   : > { %564 = vst [vmem:[%s1290_s18 + $0x20] sm:$0xff] %v449_v38  ;;  %v595_v39 = vadd.f32 %v594_v37, %v449_v38  ;;  %v633_v40 = vmul.f32 %v449_v38, %v449_v38  ;;  %v663_v41 = vadd.f32 %v662_v35, %v632_v34  ;;  %v933_v42 = vpop.f32.mrb[6].mxu0  ;;  %582 = vst [vmem:[%s1290_s18 + $0xb0] sm:$0xff] %v1316_v47  ;;  %v1320_v48 = vpop.f32.mrb[5].mxu1 }
  0xfc   : > { %567 = vst [vmem:[%s1290_s18 + $0x38] sm:$0xff] %v933_v42  ;;  %v452_v43 = vpop.f32.mrb[7].mxu0  ;;  %580 = vst [vmem:[%s1290_s18 + $0xa0] sm:$0xff] %v1320_v48  ;;  %v1324_v52 = vpop.f32.mrb[6].mxu1  ;;  %v636_v54 = vmul.f32 %v933_v42, %v933_v42  ;;  %v645_v37 = vmul.f32 %v1300_v28, %v1300_v28 }
  0xfd   : > { %v664_v44 = vadd.f32 %v663_v41, %v633_v40  ;;  %565 = vst [vmem:[%s1290_s18 + $0x28] sm:$0xff] %v452_v43  ;;  %v596_v45 = vadd.f32 %v595_v39, %v452_v43  ;;  %v634_v46 = vmul.f32 %v452_v43, %v452_v43  ;;  %583 = vst [vmem:[%s1290_s18 + $0xb8] sm:$0xff] %v1324_v52  ;;  %v1328_v53 = vpop.f32.mrb[7].mxu1 }
  0xfe   : > { %581 = vst [vmem:[%s1290_s18 + $0xa8] sm:$0xff] %v1328_v53 }
  0xff   : > { %v597_v50 = vadd.f32 %v932_v36, %v596_v45  ;;  %v665_v51 = vadd.f32 %v664_v44, %v634_v46 }
 0x101   : > { %v666_v55 = vadd.f32 %v665_v51, %v635_v49  ;;  %v936_v56 = vpop.f32.mrb[8].mxu0  ;;  %v598_v57 = vadd.f32 %v933_v42, %v597_v50 }
 0x102   : > { %570 = vst [vmem:[%s1290_s18 + $0x50] sm:$0xff] %v936_v56  ;;  %v465_v58 = vpop.f32.mrb[9].mxu0  ;;  %v1336_v3 = vpop.f32.mrb[8].mxu1  ;;  %v639_v5 = vmul.f32 %v936_v56, %v936_v56 }
 0x103   : > { %568 = vst [vmem:[%s1290_s18 + $0x40] sm:$0xff] %v465_v58  ;;  %v599_v59 = vadd.f32 %v598_v57, %v465_v58  ;;  %v637_v60 = vmul.f32 %v465_v58, %v465_v58  ;;  %v667_v61 = vadd.f32 %v666_v55, %v636_v54  ;;  %v937_v62 = vpop.f32.mrb[10].mxu0  ;;  %586 = vst [vmem:[%s1290_s18 + $0xd0] sm:$0xff] %v1336_v3  ;;  %v1340_v4 = vpop.f32.mrb[9].mxu1 }
 0x104   : > { %571 = vst [vmem:[%s1290_s18 + $0x58] sm:$0xff] %v937_v62  ;;  %v468_v63 = vpop.f32.mrb[11].mxu0  ;;  %584 = vst [vmem:[%s1290_s18 + $0xc0] sm:$0xff] %v1340_v4  ;;  %v1344_v8 = vpop.f32.mrb[10].mxu1  ;;  %v640_v10 = vmul.f32 %v937_v62, %v937_v62 }
 0x105   : > { %v668_v0 = vadd.f32 %v667_v61, %v637_v60  ;;  %569 = vst [vmem:[%s1290_s18 + $0x48] sm:$0xff] %v468_v63  ;;  %v600_v1 = vadd.f32 %v599_v59, %v468_v63  ;;  %v638_v2 = vmul.f32 %v468_v63, %v468_v63  ;;  %587 = vst [vmem:[%s1290_s18 + $0xd8] sm:$0xff] %v1344_v8  ;;  %v1348_v9 = vpop.f32.mrb[11].mxu1 }
 0x106   : > { %585 = vst [vmem:[%s1290_s18 + $0xc8] sm:$0xff] %v1348_v9 }
 0x107   : > { %v601_v6 = vadd.f32 %v936_v56, %v600_v1  ;;  %v669_v7 = vadd.f32 %v668_v0, %v638_v2 }
 0x109   : > { %v670_v11 = vadd.f32 %v669_v7, %v639_v5  ;;  %v940_v12 = vpop.f32.mrb[12].mxu0  ;;  %v602_v13 = vadd.f32 %v937_v62, %v601_v6 }
 0x10a   : > { %574 = vst [vmem:[%s1290_s18 + $0x70] sm:$0xff] %v940_v12  ;;  %v481_v14 = vpop.f32.mrb[13].mxu0  ;;  %v1358_v23 = vpop.f32.mrb[12].mxu1  ;;  %v643_v25 = vmul.f32 %v940_v12, %v940_v12 }
 0x10b   : > { %572 = vst [vmem:[%s1290_s18 + $0x60] sm:$0xff] %v481_v14  ;;  %v603_v15 = vadd.f32 %v602_v13, %v481_v14  ;;  %v641_v16 = vmul.f32 %v481_v14, %v481_v14  ;;  %v671_v17 = vadd.f32 %v670_v11, %v640_v10  ;;  %v941_v18 = vpop.f32.mrb[14].mxu0  ;;  %590 = vst [vmem:[%s1290_s18 + $0xf0] sm:$0xff] %v1358_v23  ;;  %v1362_v24 = vpop.f32.mrb[13].mxu1 }
 0x10c   : > { %575 = vst [vmem:[%s1290_s18 + $0x78] sm:$0xff] %v941_v18  ;;  %v484_v19 = vpop.f32.mrb[15].mxu0  ;;  %588 = vst [vmem:[%s1290_s18 + $0xe0] sm:$0xff] %v1362_v24  ;;  %v1373_v30 = vpop.f32.mrb[14].mxu1  ;;  %v644_v34 = vmul.f32 %v941_v18, %v941_v18 }
 0x10d   : > { %v672_v20 = vadd.f32 %v671_v17, %v641_v16  ;;  %573 = vst [vmem:[%s1290_s18 + $0x68] sm:$0xff] %v484_v19  ;;  %v604_v21 = vadd.f32 %v603_v15, %v484_v19  ;;  %v642_v22 = vmul.f32 %v484_v19, %v484_v19  ;;  %591 = vst [vmem:[%s1290_s18 + $0xf8] sm:$0xff] %v1373_v30  ;;  %v1377_v31 = vpop.f32.mrb[15].mxu1 }
 0x10e   : > { %589 = vst [vmem:[%s1290_s18 + $0xe8] sm:$0xff] %v1377_v31 }
 0x10f   : > { %v605_v26 = vadd.f32 %v940_v12, %v604_v21  ;;  %v673_v29 = vadd.f32 %v672_v20, %v642_v22 }
 0x111   : > { %v674_v35 = vadd.f32 %v673_v29, %v643_v25  ;;  %v606_v36 = vadd.f32 %v941_v18, %v605_v26 }
 0x112   : > { %1060 = shalt.err (!%p1057_p5)
}
 0x113   : > { %s1061_s6 = scalar_lea.hbm %s1367_s27, 4096  ;;  %s1065_s9 = scalar_lea.hbm %s1508_s2, 8192 }
 0x114   : > { %p1062_p6 = scmp.ne.s32.totalorder %s1367_s27, %s1061_s6  ;;  %p1066_p10 = scmp.lt.u32.totalorder %s1367_s27, %s1508_s2 }
 0x115   : > { %p1067_p11 = scmp.lt.u32.totalorder %s1065_s9, %s1061_s6  ;;  %p1069_p13 = scmp.lt.u32.totalorder %s1061_s6, %s1367_s27 }
 0x116   : > { %p1063_p7 = pnand %p1062_p6, %p1223_p4 }
 0x117   : > { %p1068_p12 = por %p1067_p11, %p1066_p10 }
 0x118   : > { %p1064_p9 = pneg %p1063_p7 }
 0x119   : > { %p1070_p0 = por %p1069_p13, %p1068_p12 }
 0x11b   : > { %p1071_p1 = pnand %p1070_p0, %p1064_p9 }
 0x11d   : > { %1074 = shalt.err (!%p1071_p1)
}
 0x11e   : > { %s1160_s19 = smov 128   ;;  %s1161_s23 = smov 8   ;;  %v607_v38 = vadd.f32 %v606_v36, %v1300_v28  ;;  %v675_v39 = vadd.f32 %v674_v35, %v644_v34  ;;  %v646_v42 = vmul.f32 %v1308_v33, %v1308_v33  ;;  %v647_v43 = vmul.f32 %v1296_v27, %v1296_v27 }
 0x11f   : > { %966 = dma.vmem_to_hbm [thread:$0]  (%p1223_p4), %s1369_s21, 4096, %s1367_s27, %s702_s28, %s1160_s19, %s1160_s19, %s1161_s23   ;;  %v648_v46 = vmul.f32 %v1304_v32, %v1304_v32  ;;  %v649_v28 = vmul.f32 %v1320_v48, %v1320_v48  ;;  %v650_v56 = vmul.f32 %v1328_v53, %v1328_v53  ;;  %v654_v0 = vmul.f32 %v1348_v9, %v1348_v9 }
 0x120   : > { %v676_v40 = vadd.f32 %v675_v39, %v645_v37  ;;  %v608_v41 = vadd.f32 %v607_v38, %v1308_v33  ;;  %v659_v12 = vmul.f32 %v1358_v23, %v1358_v23  ;;  %s854_s21 = sshll.u32 %s1287_s10, 1  ;;  %s896_s26 = sshll.u32 %s1149_s15, 5  ;;  %vm698_vm2 = vcmask 1040384  }
 0x121   : > { %s201_s27 = scalar_lea.vmem [#allocation4], %s854_s21  ;;  %s1458_s4 = scalar_lea.hbm %s1509_s3, %s896_s26 }
 0x122   : > { %v609_v44 = vadd.f32 %v1296_v27, %v608_v41  ;;  %v677_v45 = vadd.f32 %v676_v40, %v646_v42  ;;  %v651_v27 = vmul.f32 %v1316_v47, %v1316_v47  ;;  %s739_s28 = sshll.u32 %s201_s27, 4  ;;  %s707_s5 = scalar_lea.sflag [#allocation5], %s1287_s10  ;;  %s1460_s28 = int_to_ptr.vmem [resolvable:$true] %s739_s28 }
 0x123   : > { %s1075_s6 = scalar_lea.vmem %s1460_s28, 32  ;;  %s1162_s15 = smov [#allocation4]  }
 0x124   : > { %v678_v49 = vadd.f32 %v677_v45, %v647_v43  ;;  %v610_v50 = vadd.f32 %v1304_v32, %v609_v44  ;;  %v652_v32 = vmul.f32 %v1324_v52, %v1324_v52  ;;  %p1076_p2 = scmp.ne.s32.totalorder %s1460_s28, %s1075_s6  ;;  %s1079_s7 = sshll.u32 %s1162_s15, 4  ;;  %s1080_s7 = int_to_ptr.vmem [resolvable:$false] %s1079_s7 }
 0x125   : > { %s1081_s8 = scalar_lea.vmem %s1080_s7, 64  ;;  %p1082_p6 = scmp.lt.s32.totalorder %s1460_s28, %s1080_s7 }
 0x126   : > { %v611_v51 = vadd.f32 %v610_v50, %v1320_v48  ;;  %v679_v54 = vadd.f32 %v678_v49, %v648_v46  ;;  %v653_v48 = vmul.f32 %v1340_v4, %v1340_v4  ;;  %p1077_p3 = pnand %p1076_p2, %p1223_p4  ;;  %p1083_p7 = scmp.lt.s32.totalorder %s1081_s8, %s1075_s6 }
 0x128   : > { %v680_v55 = vadd.f32 %v679_v54, %v649_v28  ;;  %v612_v33 = vadd.f32 %v611_v51, %v1328_v53  ;;  %p1078_p5 = pneg %p1077_p3  ;;  %p1084_p9 = por %p1083_p7, %p1082_p6 }
 0x12a   : > { %v613_v57 = vadd.f32 %v1316_v47, %v612_v33  ;;  %v681_v58 = vadd.f32 %v680_v55, %v650_v56  ;;  %v655_v47 = vmul.f32 %v1336_v3, %v1336_v3  ;;  %p1085_p10 = pnand %p1084_p9, %p1078_p5 }
 0x12c   : > { %v682_v59 = vadd.f32 %v681_v58, %v651_v27  ;;  %v614_v60 = vadd.f32 %v1324_v52, %v613_v57  ;;  %v656_v52 = vmul.f32 %v1344_v8, %v1344_v8 }
 0x12e   : > { %v615_v61 = vadd.f32 %v614_v60, %v1340_v4  ;;  %v683_v62 = vadd.f32 %v682_v59, %v652_v32  ;;  %v657_v4 = vmul.f32 %v1362_v24, %v1362_v24 }
 0x130   : > { %v684_v63 = vadd.f32 %v683_v62, %v653_v48  ;;  %v616_v53 = vadd.f32 %v615_v61, %v1348_v9 }
 0x132   : > { %v617_v1 = vadd.f32 %v1336_v3, %v616_v53  ;;  %v685_v2 = vadd.f32 %v684_v63, %v654_v0  ;;  %v658_v3 = vmul.f32 %v1377_v31, %v1377_v31 }
 0x134   : > { %v686_v5 = vadd.f32 %v685_v2, %v655_v47  ;;  %v618_v6 = vadd.f32 %v1344_v8, %v617_v1  ;;  %v660_v8 = vmul.f32 %v1373_v30, %v1373_v30 }
 0x136   : > { %v619_v7 = vadd.f32 %v618_v6, %v1362_v24  ;;  %v687_v10 = vadd.f32 %v686_v5, %v656_v52 }
 0x138   : > { %v688_v9 = vadd.f32 %v687_v10, %v657_v4  ;;  %v620_v11 = vadd.f32 %v619_v7, %v1377_v31 }
 0x13a   : > { %v621_v13 = vadd.f32 %v1358_v23, %v620_v11  ;;  %v689_v14 = vadd.f32 %v688_v9, %v658_v3 }
 0x13c   : > { %v622_v15 = vadd.f32 %v1373_v30, %v621_v13  ;;  %v690_v16 = vadd.f32 %v689_v14, %v659_v12 }
 0x13e   : > { %v623_v17 = vrot.slane %v622_v15, 4  ;;  %v691_v18 = vadd.f32 %v690_v16, %v660_v8 }
 0x140   : > { %v624_v19 = vadd.f32 %v623_v17, %v622_v15  ;;  %v692_v20 = vrot.slane %v691_v18, 4 }
 0x142   : > { %v625_v21 = vrot.slane %v624_v19, 2  ;;  %v693_v22 = vadd.f32 %v692_v20, %v691_v18 }
 0x144   : > { %v626_v24 = vadd.f32 %v625_v21, %v624_v19  ;;  %v694_v25 = vrot.slane %v693_v22, 2 }
 0x146   : > { %v627_v26 = vrot.slane %v626_v24, 1  ;;  %v695_v23 = vadd.f32 %v694_v25, %v693_v22 }
 0x148   : > { %v696_v29 = vrot.slane %v695_v23, 1  ;;  %v628_v30 = vadd.f32 %v627_v26, %v626_v24 }
 0x14a   : > { %v697_v31 = vadd.f32 %v696_v29, %v695_v23 }
 0x14c   : > { %v699_v34 = vsel %vm698_vm2, %v628_v30, %v697_v31 }
 0x14d   : > { %700 = vst [vmem:[%s201_s27] sm:$0x3] %v699_v34 }
 0x14e   : > { %1088 = shalt.err (!%p1085_p10)
}
 0x14f   : > { %s1089_s10 = scalar_lea.hbm %s1458_s4, 32  ;;  %s1093_s18 = scalar_lea.hbm %s1509_s3, 64 }
 0x150   : > { %p1090_p11 = scmp.ne.s32.totalorder %s1458_s4, %s1089_s10  ;;  %p1094_p0 = scmp.lt.u32.totalorder %s1458_s4, %s1509_s3 }
 0x151   : > { %p1095_p1 = scmp.lt.u32.totalorder %s1093_s18, %s1089_s10  ;;  %p1097_p3 = scmp.lt.u32.totalorder %s1089_s10, %s1458_s4 }
 0x152   : > { %p1091_p12 = pnand %p1090_p11, %p1223_p4 }
 0x153   : > { %p1096_p2 = por %p1095_p1, %p1094_p0 }
 0x154   : > { %p1092_p13 = pneg %p1091_p12 }
 0x155   : > { %p1098_p5 = por %p1097_p3, %p1096_p2 }
 0x157   : > { %p1099_p6 = pnand %p1098_p5, %p1092_p13 }
 0x159   : > { %1102 = shalt.err (!%p1099_p6)
}
 0x15a   : > { %967 = dma.vmem_to_hbm [thread:$0]  (%p1223_p4), %s1460_s28, 32, %s1458_s4, %s707_s5  }
 0x15b PF: > { %p977_p7 = scmp.ge.s32.totalorder %s1157_s17, 2  ;;  %s751_s21 = sand.u32 1, %s1137_s12  }
 0x15c   : > { %s752_s26 = scalar_lea.sflag [#allocation3], %s751_s21 }
 0x15d   : > { %p971_p9 = pnand %p977_p7, %p1230_p8 }
 0x15f   : > { %1128 = dma.done.wait (!%p971_p9), %s752_s26, 4096  }
 0x160   : > { %1130 = vsyncadd (!%p971_p9), %s752_s26, 4294963200  ;;  %s761_s27 = scalar_lea.sflag [#allocation5], %s751_s21 }
 0x161   : > { %1132 = dma.done.wait (!%p971_p9), %s761_s27, 32  }
 0x162   : > { %1134 = vsyncadd (!%p971_p9), %s761_s27, 4294967264  ;;  %s20_s17 = sadd.s32 1, %s1157_s17   ;;  %s1512_s12 = smov %s1141_s13 }
 0x163   : > { %p17_p10 = scmp.ge.s32.totalorder %s20_s17, 4   ;;  %s1513_s13 = smov %s1145_s14 }
 0x164   : > { %s1514_s14 = smov %s1236_s25  ;;  %s1515_s15 = smov %s1153_s16 }
 0x165   : > { %s1516_s16 = smov %s1518_s20  ;;  %19 = sbr.rel (!%p17_p10) target bundleno = 6 (0x6), region = 80 }
 0x16c   :  { %766 = vsyncpa [#allocation3], 1 }
 0x16d   :  { %768 = vsyncpa [#allocation3 + $0x1], 1 }
 0x16e   :  { %769 = vsyncpa [#allocation5], 1 }
 0x16f   :  { %771 = vsyncpa [#allocation5 + $0x1], 1 }

</bundles_post_ra>
